<compile_context>
chip_gen: v6e
topology: v6e:2x2x1
jax: 0.10.0
libtpu: 0.0.40
codegen_flags: <defaults>
</compile_context>

<pallas_src>
import functools

import jax
import jax.numpy as jnp
from jax.experimental import pallas as pl
from jax.experimental.pallas import tpu as pltpu


def _firstnet_kernel(x_ref, wf_ref, bf_ref, whh_ref, bhhn_ref, out_ref,
                     *, seq_len, batch, hp):
    """Fused Linear + (eval) Dropout + single-layer GRU; writes the final hidden state.

    x_ref    : (seq*batch, input_dim)     time-major row blocks, batch padded to 8
    wf_ref   : (input_dim, 3*Hp)          fused W_lin @ W_ih, gate-padded to 128 lanes
    bf_ref   : (1, 3*Hp)                  fused bias (b_lin@W_ih + b_ih + b_hh[r|z])
    whh_ref  : (Hp, 3*Hp)                 hidden-to-hidden weights, gate-padded
    bhhn_ref : (1, Hp)                    n-gate slice of b_hh (kept inside r*(...))
    out_ref  : (batch, Hp)                final hidden state (lane-dense store)
    """
    Hp = hp
    B = batch

    # Single MXU matmul for all time steps at once (Linear already fused in).
    gates_x = (jnp.dot(x_ref[...], wf_ref[...], preferred_element_type=jnp.float32)
               + bf_ref[...])                                    # (T*B, 3*Hp)

    # Hoisted broadcasts / loads (JAX does not CSE broadcast_in_dim inside loops).
    bhh_n = jnp.broadcast_to(bhhn_ref[...], (B, Hp))             # (B, Hp)
    whh = whh_ref[...]                                           # (Hp, 3*Hp)

    # h_0 = 0 (PyTorch default).  Carried in vregs, never round-tripped through VMEM.
    h = jnp.zeros((B, Hp), jnp.float32)

    # Sequential GRU recurrence (short, statically unrolled; gate order [r|z|n]).
    for t in range(seq_len):
        gx = gates_x[t * B:(t + 1) * B, :]                       # (B, 3*Hp), aligned block
        gh = jnp.dot(h, whh, preferred_element_type=jnp.float32)  # (B, 3*Hp)

        r = jax.nn.sigmoid(gx[:, 0:Hp] + gh[:, 0:Hp])
        z = jax.nn.sigmoid(gx[:, Hp:2 * Hp] + gh[:, Hp:2 * Hp])
        n = jnp.tanh(gx[:, 2 * Hp:3 * Hp] + r * (gh[:, 2 * Hp:3 * Hp] + bhh_n))
        h = (1.0 - z) * n + z * h

    out_ref[...] = h


def firstnet_forward(x, params):
    """x: (batch, seq, input_dim) float32.  Returns (batch, 1, state_dim) == hn.transpose(0,1)."""
    B, T, Din = x.shape
    w_lin, b_lin, w_ih, b_ih, w_hh, b_hh = params
    H = w_hh.shape[0]
    Hp = ((H + 127) // 128) * 128          # each gate padded to its own 128-lane block
    Bp = ((B + 7) // 8) * 8                # sublane-aligned time blocks

    # --- Fuse Linear into the GRU input projection (dropout is identity in eval). ---
    w_fused = w_lin @ w_ih                 # (Din, 3H)
    b_fused = b_lin @ w_ih + b_ih          # (1, 3H)
    # Fold the r/z slices of b_hh into the fused bias (they only ever appear as gx+gh).
    b_fused = b_fused.at[:, :2 * H].add(b_hh[:, :2 * H])

    # --- Lane-align the gate layout: gate g lives in lanes [g*Hp, g*Hp+H). ---
    def pad_gates(w):
        rows = w.shape[0]
        out = jnp.zeros((rows, 3 * Hp), jnp.float32)
        for g in range(3):
            out = out.at[:, g * Hp:g * Hp + H].set(w[:, g * H:(g + 1) * H])
        return out

    wf_p = pad_gates(w_fused)                                    # (Din, 3*Hp)
    bf_p = pad_gates(b_fused)                                    # (1, 3*Hp)
    whh_p = jnp.zeros((Hp, 3 * Hp), jnp.float32)
    for g in range(3):
        whh_p = whh_p.at[:H, g * Hp:g * Hp + H].set(w_hh[:, g * H:(g + 1) * H])
    bhhn_p = jnp.zeros((1, Hp), jnp.float32).at[:, :H].set(b_hh[:, 2 * H:3 * H])

    # (batch, seq, in) -> (seq, batch, in) -> (seq*Bp, in): time-major row blocks.
    # (Wrapper-side transpose is one tiny XLA op; cheaper than an in-kernel strided gather.)
    x_tm = jnp.transpose(x, (1, 0, 2))
    if Bp != B:
        x_tm = jnp.pad(x_tm, ((0, 0), (0, Bp - B), (0, 0)))
    x_tm = x_tm.reshape(T * Bp, Din)

    kern = functools.partial(_firstnet_kernel, seq_len=T, batch=Bp, hp=Hp)
    full = lambda shape: pl.BlockSpec(shape, lambda i: (0,) * len(shape))

    out = pl.pallas_call(
        kern,
        out_shape=jax.ShapeDtypeStruct((Bp, Hp), jnp.float32),
        grid=(1,),
        in_specs=[
            full((T * Bp, Din)),
            full((Din, 3 * Hp)), full((1, 3 * Hp)),
            full((Hp, 3 * Hp)), full((1, Hp)),
        ],
        out_specs=full((Bp, Hp)),
        compiler_params=pltpu.CompilerParams(
            dimension_semantics=("arbitrary",)),
    )(x_tm, wf_p, bf_p, whh_p, bhhn_p)

    # hn has shape (num_layers=1, B, H); hn.transpose(0,1) -> (B, 1, H).
    return out[:B, :H].reshape(B, 1, H)


def firstnet_reference(x, params):
    """Pure-JAX reference of the PyTorch forward (eval-mode dropout), unfused math."""
    w_lin, b_lin, w_ih, b_ih, w_hh, b_hh = params
    H = w_hh.shape[0]
    rnn_in = x @ w_lin + b_lin                                   # (B, T, rnn_dim)
    B, T, _ = rnn_in.shape
    h = jnp.zeros((B, H), jnp.float32)
    for t in range(T):
        gx = rnn_in[:, t, :] @ w_ih + b_ih
        gh = h @ w_hh + b_hh
        r = jax.nn.sigmoid(gx[:, 0:H] + gh[:, 0:H])
        z = jax.nn.sigmoid(gx[:, H:2 * H] + gh[:, H:2 * H])
        n = jnp.tanh(gx[:, 2 * H:3 * H] + r * gh[:, 2 * H:3 * H])
        h = (1.0 - z) * n + z * h
    return h.reshape(B, 1, H)


def init_params(key, input_dim, rnn_dim, state_dim):
    """Deterministic parameter init matching PyTorch shapes (stored pre-transposed)."""
    ks = jax.random.split(key, 6)
    lin_bound = 1.0 / jnp.sqrt(input_dim)
    gru_bound = 1.0 / jnp.sqrt(state_dim)
    # nn.Linear: weight (rnn_dim, input_dim) -> stored as (input_dim, rnn_dim)
    w_lin = jax.random.uniform(ks[0], (input_dim, rnn_dim), jnp.float32,
                               -lin_bound, lin_bound)
    b_lin = jax.random.uniform(ks[1], (1, rnn_dim), jnp.float32, -lin_bound, lin_bound)
    # nn.GRU: weight_ih_l0 (3H, rnn_dim) -> (rnn_dim, 3H); weight_hh_l0 (3H, H) -> (H, 3H)
    w_ih = jax.random.uniform(ks[2], (rnn_dim, 3 * state_dim), jnp.float32,
                              -gru_bound, gru_bound)
    b_ih = jax.random.uniform(ks[3], (1, 3 * state_dim), jnp.float32,
                              -gru_bound, gru_bound)
    w_hh = jax.random.uniform(ks[4], (state_dim, 3 * state_dim), jnp.float32,
                              -gru_bound, gru_bound)
    b_hh = jax.random.uniform(ks[5], (1, 3 * state_dim), jnp.float32,
                              -gru_bound, gru_bound)
    return (w_lin, b_lin, w_ih, b_ih, w_hh, b_hh)


if __name__ == "__main__":
    # Small shapes consistent with the module: x ~ (batch, seq, input_dim=10).
    BATCH, SEQ, INPUT_DIM = 8, 5, 10
    RNN_DIM, STATE_DIM = 16, 32

    key = jax.random.PRNGKey(0)
    kx, kp = jax.random.split(key)
    x = jax.random.normal(kx, (BATCH, SEQ, INPUT_DIM), jnp.float32)
    params = init_params(kp, INPUT_DIM, RNN_DIM, STATE_DIM)

    out = jax.block_until_ready(firstnet_forward(x, params))
    ref = jax.block_until_ready(firstnet_reference(x, params))

    assert out.shape == (BATCH, 1, STATE_DIM), out.shape
    assert jnp.allclose(out, ref, atol=2e-5, rtol=2e-5), \
        float(jnp.max(jnp.abs(out - ref)))
    print("KERNEL_OK")
</pallas_src>

<mosaic_0001>
module attributes {stable_mosaic.version = 11 : i64} {
  func.func @_firstnet_kernel(%arg0: i32, %arg1: memref<40x10xf32, #tpu.memory_space<vmem>>, %arg2: memref<10x384xf32, #tpu.memory_space<vmem>>, %arg3: memref<1x384xf32, #tpu.memory_space<vmem>>, %arg4: memref<128x384xf32, #tpu.memory_space<vmem>>, %arg5: memref<1x128xf32, #tpu.memory_space<vmem>>, %arg6: memref<8x128xf32, #tpu.memory_space<vmem>>) attributes {dimension_semantics = [#tpu.dimension_semantics<arbitrary>], iteration_bounds = array<i64: 1>, scalar_prefetch = 0 : i64, scratch_operands = 0 : i64, tpu.core_type = #tpu.core_type<tc>, window_params = [{pipeline_mode = #tpu.pipeline_mode<synchronous>, transform_indices = @transform_0, window_bounds = array<i64: 40, 10>}, {pipeline_mode = #tpu.pipeline_mode<synchronous>, transform_indices = @transform_1, window_bounds = array<i64: 10, 384>}, {pipeline_mode = #tpu.pipeline_mode<synchronous>, transform_indices = @transform_2, window_bounds = array<i64: 1, 384>}, {pipeline_mode = #tpu.pipeline_mode<synchronous>, transform_indices = @transform_3, window_bounds = array<i64: 128, 384>}, {pipeline_mode = #tpu.pipeline_mode<synchronous>, transform_indices = @transform_4, window_bounds = array<i64: 1, 128>}, {pipeline_mode = #tpu.pipeline_mode<synchronous>, transform_indices = @transform_5, window_bounds = array<i64: 8, 128>}]} {
    %c0 = arith.constant 0 : index
    %c0_0 = arith.constant 0 : index
    %0 = vector.load %arg1[%c0, %c0_0] : memref<40x10xf32, #tpu.memory_space<vmem>>, vector<40x10xf32>
    %c0_1 = arith.constant 0 : index
    %c0_2 = arith.constant 0 : index
    %1 = vector.load %arg2[%c0_1, %c0_2] : memref<10x384xf32, #tpu.memory_space<vmem>>, vector<10x384xf32>
    %cst = arith.constant dense<0.000000e+00> : vector<40x384xf32>
    %2 = tpu.matmul %0, %1, %cst {dimension_numbers = #tpu.dot_dimension_numbers<[1], [0], [0], [1], [0, 0, 1, 1], [], []>} : vector<40x10xf32>, vector<10x384xf32>, vector<40x384xf32> -> vector<40x384xf32>
    %c0_3 = arith.constant 0 : index
    %c0_4 = arith.constant 0 : index
    %3 = vector.load %arg3[%c0_3, %c0_4] : memref<1x384xf32, #tpu.memory_space<vmem>>, vector<1x384xf32>
    %4 = vector.broadcast %3 : vector<1x384xf32> to vector<40x384xf32>
    %5 = arith.addf %2, %4 : vector<40x384xf32>
    %c0_5 = arith.constant 0 : index
    %c0_6 = arith.constant 0 : index
    %6 = vector.load %arg5[%c0_5, %c0_6] : memref<1x128xf32, #tpu.memory_space<vmem>>, vector<1x128xf32>
    %7 = vector.shape_cast %6 : vector<1x128xf32> to vector<1x128xf32>
    %8 = vector.broadcast %7 : vector<1x128xf32> to vector<8x128xf32>
    %c0_7 = arith.constant 0 : index
    %c0_8 = arith.constant 0 : index
    %9 = vector.load %arg4[%c0_7, %c0_8] : memref<128x384xf32, #tpu.memory_space<vmem>>, vector<128x384xf32>
    %cst_9 = arith.constant 0.000000e+00 : f32
    %10 = vector.broadcast %cst_9 : f32 to vector<8x128xf32>
    %11 = vector.extract_strided_slice %5 {offsets = [0, 0], sizes = [8, 384], strides = [1, 1]} : vector<40x384xf32> to vector<8x384xf32>
    %cst_10 = arith.constant dense<0.000000e+00> : vector<8x384xf32>
    %12 = tpu.matmul %10, %9, %cst_10 {dimension_numbers = #tpu.dot_dimension_numbers<[1], [0], [0], [1], [0, 0, 1, 1], [], []>} : vector<8x128xf32>, vector<128x384xf32>, vector<8x384xf32> -> vector<8x384xf32>
    %13 = vector.extract_strided_slice %11 {offsets = [0, 0], sizes = [8, 128], strides = [1, 1]} : vector<8x384xf32> to vector<8x128xf32>
    %14 = vector.extract_strided_slice %12 {offsets = [0, 0], sizes = [8, 128], strides = [1, 1]} : vector<8x384xf32> to vector<8x128xf32>
    %15 = arith.addf %13, %14 : vector<8x128xf32>
    %16 = arith.negf %15 : vector<8x128xf32>
    %17 = math.exp %16 : vector<8x128xf32>
    %cst_11 = arith.constant 1.000000e+00 : f32
    %18 = vector.broadcast %cst_11 : f32 to vector<8x128xf32>
    %19 = arith.addf %18, %17 : vector<8x128xf32>
    %20 = arith.divf %18, %19 : vector<8x128xf32>
    %21 = vector.extract_strided_slice %11 {offsets = [0, 128], sizes = [8, 128], strides = [1, 1]} : vector<8x384xf32> to vector<8x128xf32>
    %22 = vector.extract_strided_slice %12 {offsets = [0, 128], sizes = [8, 128], strides = [1, 1]} : vector<8x384xf32> to vector<8x128xf32>
    %23 = arith.addf %21, %22 : vector<8x128xf32>
    %24 = arith.negf %23 : vector<8x128xf32>
    %25 = math.exp %24 : vector<8x128xf32>
    %cst_12 = arith.constant 1.000000e+00 : f32
    %26 = vector.broadcast %cst_12 : f32 to vector<8x128xf32>
    %27 = arith.addf %26, %25 : vector<8x128xf32>
    %28 = arith.divf %26, %27 : vector<8x128xf32>
    %29 = vector.extract_strided_slice %11 {offsets = [0, 256], sizes = [8, 128], strides = [1, 1]} : vector<8x384xf32> to vector<8x128xf32>
    %30 = vector.extract_strided_slice %12 {offsets = [0, 256], sizes = [8, 128], strides = [1, 1]} : vector<8x384xf32> to vector<8x128xf32>
    %31 = arith.addf %30, %8 : vector<8x128xf32>
    %32 = arith.mulf %20, %31 : vector<8x128xf32>
    %33 = arith.addf %29, %32 : vector<8x128xf32>
    %34 = math.tanh %33 : vector<8x128xf32>
    %cst_13 = arith.constant 1.000000e+00 : f32
    %35 = vector.broadcast %cst_13 : f32 to vector<8x128xf32>
    %36 = arith.subf %35, %28 : vector<8x128xf32>
    %37 = arith.mulf %36, %34 : vector<8x128xf32>
    %38 = arith.mulf %28, %10 : vector<8x128xf32>
    %39 = arith.addf %37, %38 : vector<8x128xf32>
    %40 = vector.extract_strided_slice %5 {offsets = [8, 0], sizes = [8, 384], strides = [1, 1]} : vector<40x384xf32> to vector<8x384xf32>
    %cst_14 = arith.constant dense<0.000000e+00> : vector<8x384xf32>
    %41 = tpu.matmul %39, %9, %cst_14 {dimension_numbers = #tpu.dot_dimension_numbers<[1], [0], [0], [1], [0, 0, 1, 1], [], []>} : vector<8x128xf32>, vector<128x384xf32>, vector<8x384xf32> -> vector<8x384xf32>
    %42 = vector.extract_strided_slice %40 {offsets = [0, 0], sizes = [8, 128], strides = [1, 1]} : vector<8x384xf32> to vector<8x128xf32>
    %43 = vector.extract_strided_slice %41 {offsets = [0, 0], sizes = [8, 128], strides = [1, 1]} : vector<8x384xf32> to vector<8x128xf32>
    %44 = arith.addf %42, %43 : vector<8x128xf32>
    %45 = arith.negf %44 : vector<8x128xf32>
    %46 = math.exp %45 : vector<8x128xf32>
    %cst_15 = arith.constant 1.000000e+00 : f32
    %47 = vector.broadcast %cst_15 : f32 to vector<8x128xf32>
    %48 = arith.addf %47, %46 : vector<8x128xf32>
    %49 = arith.divf %47, %48 : vector<8x128xf32>
    %50 = vector.extract_strided_slice %40 {offsets = [0, 128], sizes = [8, 128], strides = [1, 1]} : vector<8x384xf32> to vector<8x128xf32>
    %51 = vector.extract_strided_slice %41 {offsets = [0, 128], sizes = [8, 128], strides = [1, 1]} : vector<8x384xf32> to vector<8x128xf32>
    %52 = arith.addf %50, %51 : vector<8x128xf32>
    %53 = arith.negf %52 : vector<8x128xf32>
    %54 = math.exp %53 : vector<8x128xf32>
    %cst_16 = arith.constant 1.000000e+00 : f32
    %55 = vector.broadcast %cst_16 : f32 to vector<8x128xf32>
    %56 = arith.addf %55, %54 : vector<8x128xf32>
    %57 = arith.divf %55, %56 : vector<8x128xf32>
    %58 = vector.extract_strided_slice %40 {offsets = [0, 256], sizes = [8, 128], strides = [1, 1]} : vector<8x384xf32> to vector<8x128xf32>
    %59 = vector.extract_strided_slice %41 {offsets = [0, 256], sizes = [8, 128], strides = [1, 1]} : vector<8x384xf32> to vector<8x128xf32>
    %60 = arith.addf %59, %8 : vector<8x128xf32>
    %61 = arith.mulf %49, %60 : vector<8x128xf32>
    %62 = arith.addf %58, %61 : vector<8x128xf32>
    %63 = math.tanh %62 : vector<8x128xf32>
    %cst_17 = arith.constant 1.000000e+00 : f32
    %64 = vector.broadcast %cst_17 : f32 to vector<8x128xf32>
    %65 = arith.subf %64, %57 : vector<8x128xf32>
    %66 = arith.mulf %65, %63 : vector<8x128xf32>
    %67 = arith.mulf %57, %39 : vector<8x128xf32>
    %68 = arith.addf %66, %67 : vector<8x128xf32>
    %69 = vector.extract_strided_slice %5 {offsets = [16, 0], sizes = [8, 384], strides = [1, 1]} : vector<40x384xf32> to vector<8x384xf32>
    %cst_18 = arith.constant dense<0.000000e+00> : vector<8x384xf32>
    %70 = tpu.matmul %68, %9, %cst_18 {dimension_numbers = #tpu.dot_dimension_numbers<[1], [0], [0], [1], [0, 0, 1, 1], [], []>} : vector<8x128xf32>, vector<128x384xf32>, vector<8x384xf32> -> vector<8x384xf32>
    %71 = vector.extract_strided_slice %69 {offsets = [0, 0], sizes = [8, 128], strides = [1, 1]} : vector<8x384xf32> to vector<8x128xf32>
    %72 = vector.extract_strided_slice %70 {offsets = [0, 0], sizes = [8, 128], strides = [1, 1]} : vector<8x384xf32> to vector<8x128xf32>
    %73 = arith.addf %71, %72 : vector<8x128xf32>
    %74 = arith.negf %73 : vector<8x128xf32>
    %75 = math.exp %74 : vector<8x128xf32>
    %cst_19 = arith.constant 1.000000e+00 : f32
    %76 = vector.broadcast %cst_19 : f32 to vector<8x128xf32>
    %77 = arith.addf %76, %75 : vector<8x128xf32>
    %78 = arith.divf %76, %77 : vector<8x128xf32>
    %79 = vector.extract_strided_slice %69 {offsets = [0, 128], sizes = [8, 128], strides = [1, 1]} : vector<8x384xf32> to vector<8x128xf32>
    %80 = vector.extract_strided_slice %70 {offsets = [0, 128], sizes = [8, 128], strides = [1, 1]} : vector<8x384xf32> to vector<8x128xf32>
    %81 = arith.addf %79, %80 : vector<8x128xf32>
    %82 = arith.negf %81 : vector<8x128xf32>
    %83 = math.exp %82 : vector<8x128xf32>
    %cst_20 = arith.constant 1.000000e+00 : f32
    %84 = vector.broadcast %cst_20 : f32 to vector<8x128xf32>
    %85 = arith.addf %84, %83 : vector<8x128xf32>
    %86 = arith.divf %84, %85 : vector<8x128xf32>
    %87 = vector.extract_strided_slice %69 {offsets = [0, 256], sizes = [8, 128], strides = [1, 1]} : vector<8x384xf32> to vector<8x128xf32>
    %88 = vector.extract_strided_slice %70 {offsets = [0, 256], sizes = [8, 128], strides = [1, 1]} : vector<8x384xf32> to vector<8x128xf32>
    %89 = arith.addf %88, %8 : vector<8x128xf32>
    %90 = arith.mulf %78, %89 : vector<8x128xf32>
    %91 = arith.addf %87, %90 : vector<8x128xf32>
    %92 = math.tanh %91 : vector<8x128xf32>
    %cst_21 = arith.constant 1.000000e+00 : f32
    %93 = vector.broadcast %cst_21 : f32 to vector<8x128xf32>
    %94 = arith.subf %93, %86 : vector<8x128xf32>
    %95 = arith.mulf %94, %92 : vector<8x128xf32>
    %96 = arith.mulf %86, %68 : vector<8x128xf32>
    %97 = arith.addf %95, %96 : vector<8x128xf32>
    %98 = vector.extract_strided_slice %5 {offsets = [24, 0], sizes = [8, 384], strides = [1, 1]} : vector<40x384xf32> to vector<8x384xf32>
    %cst_22 = arith.constant dense<0.000000e+00> : vector<8x384xf32>
    %99 = tpu.matmul %97, %9, %cst_22 {dimension_numbers = #tpu.dot_dimension_numbers<[1], [0], [0], [1], [0, 0, 1, 1], [], []>} : vector<8x128xf32>, vector<128x384xf32>, vector<8x384xf32> -> vector<8x384xf32>
    %100 = vector.extract_strided_slice %98 {offsets = [0, 0], sizes = [8, 128], strides = [1, 1]} : vector<8x384xf32> to vector<8x128xf32>
    %101 = vector.extract_strided_slice %99 {offsets = [0, 0], sizes = [8, 128], strides = [1, 1]} : vector<8x384xf32> to vector<8x128xf32>
    %102 = arith.addf %100, %101 : vector<8x128xf32>
    %103 = arith.negf %102 : vector<8x128xf32>
    %104 = math.exp %103 : vector<8x128xf32>
    %cst_23 = arith.constant 1.000000e+00 : f32
    %105 = vector.broadcast %cst_23 : f32 to vector<8x128xf32>
    %106 = arith.addf %105, %104 : vector<8x128xf32>
    %107 = arith.divf %105, %106 : vector<8x128xf32>
    %108 = vector.extract_strided_slice %98 {offsets = [0, 128], sizes = [8, 128], strides = [1, 1]} : vector<8x384xf32> to vector<8x128xf32>
    %109 = vector.extract_strided_slice %99 {offsets = [0, 128], sizes = [8, 128], strides = [1, 1]} : vector<8x384xf32> to vector<8x128xf32>
    %110 = arith.addf %108, %109 : vector<8x128xf32>
    %111 = arith.negf %110 : vector<8x128xf32>
    %112 = math.exp %111 : vector<8x128xf32>
    %cst_24 = arith.constant 1.000000e+00 : f32
    %113 = vector.broadcast %cst_24 : f32 to vector<8x128xf32>
    %114 = arith.addf %113, %112 : vector<8x128xf32>
    %115 = arith.divf %113, %114 : vector<8x128xf32>
    %116 = vector.extract_strided_slice %98 {offsets = [0, 256], sizes = [8, 128], strides = [1, 1]} : vector<8x384xf32> to vector<8x128xf32>
    %117 = vector.extract_strided_slice %99 {offsets = [0, 256], sizes = [8, 128], strides = [1, 1]} : vector<8x384xf32> to vector<8x128xf32>
    %118 = arith.addf %117, %8 : vector<8x128xf32>
    %119 = arith.mulf %107, %118 : vector<8x128xf32>
    %120 = arith.addf %116, %119 : vector<8x128xf32>
    %121 = math.tanh %120 : vector<8x128xf32>
    %cst_25 = arith.constant 1.000000e+00 : f32
    %122 = vector.broadcast %cst_25 : f32 to vector<8x128xf32>
    %123 = arith.subf %122, %115 : vector<8x128xf32>
    %124 = arith.mulf %123, %121 : vector<8x128xf32>
    %125 = arith.mulf %115, %97 : vector<8x128xf32>
    %126 = arith.addf %124, %125 : vector<8x128xf32>
    %127 = vector.extract_strided_slice %5 {offsets = [32, 0], sizes = [8, 384], strides = [1, 1]} : vector<40x384xf32> to vector<8x384xf32>
    %cst_26 = arith.constant dense<0.000000e+00> : vector<8x384xf32>
    %128 = tpu.matmul %126, %9, %cst_26 {dimension_numbers = #tpu.dot_dimension_numbers<[1], [0], [0], [1], [0, 0, 1, 1], [], []>} : vector<8x128xf32>, vector<128x384xf32>, vector<8x384xf32> -> vector<8x384xf32>
    %129 = vector.extract_strided_slice %127 {offsets = [0, 0], sizes = [8, 128], strides = [1, 1]} : vector<8x384xf32> to vector<8x128xf32>
    %130 = vector.extract_strided_slice %128 {offsets = [0, 0], sizes = [8, 128], strides = [1, 1]} : vector<8x384xf32> to vector<8x128xf32>
    %131 = arith.addf %129, %130 : vector<8x128xf32>
    %132 = arith.negf %131 : vector<8x128xf32>
    %133 = math.exp %132 : vector<8x128xf32>
    %cst_27 = arith.constant 1.000000e+00 : f32
    %134 = vector.broadcast %cst_27 : f32 to vector<8x128xf32>
    %135 = arith.addf %134, %133 : vector<8x128xf32>
    %136 = arith.divf %134, %135 : vector<8x128xf32>
    %137 = vector.extract_strided_slice %127 {offsets = [0, 128], sizes = [8, 128], strides = [1, 1]} : vector<8x384xf32> to vector<8x128xf32>
    %138 = vector.extract_strided_slice %128 {offsets = [0, 128], sizes = [8, 128], strides = [1, 1]} : vector<8x384xf32> to vector<8x128xf32>
    %139 = arith.addf %137, %138 : vector<8x128xf32>
    %140 = arith.negf %139 : vector<8x128xf32>
    %141 = math.exp %140 : vector<8x128xf32>
    %cst_28 = arith.constant 1.000000e+00 : f32
    %142 = vector.broadcast %cst_28 : f32 to vector<8x128xf32>
    %143 = arith.addf %142, %141 : vector<8x128xf32>
    %144 = arith.divf %142, %143 : vector<8x128xf32>
    %145 = vector.extract_strided_slice %127 {offsets = [0, 256], sizes = [8, 128], strides = [1, 1]} : vector<8x384xf32> to vector<8x128xf32>
    %146 = vector.extract_strided_slice %128 {offsets = [0, 256], sizes = [8, 128], strides = [1, 1]} : vector<8x384xf32> to vector<8x128xf32>
    %147 = arith.addf %146, %8 : vector<8x128xf32>
    %148 = arith.mulf %136, %147 : vector<8x128xf32>
    %149 = arith.addf %145, %148 : vector<8x128xf32>
    %150 = math.tanh %149 : vector<8x128xf32>
    %cst_29 = arith.constant 1.000000e+00 : f32
    %151 = vector.broadcast %cst_29 : f32 to vector<8x128xf32>
    %152 = arith.subf %151, %144 : vector<8x128xf32>
    %153 = arith.mulf %152, %150 : vector<8x128xf32>
    %154 = arith.mulf %144, %126 : vector<8x128xf32>
    %155 = arith.addf %153, %154 : vector<8x128xf32>
    %c0_30 = arith.constant 0 : index
    %c0_31 = arith.constant 0 : index
    %156 = vector.load %arg6[%c0_30, %c0_31] : memref<8x128xf32, #tpu.memory_space<vmem>>, vector<8x128xf32>
    tpu.vector_store %arg6[%c0_30, %c0_31], %155 {strides = array<i32>} : memref<8x128xf32, #tpu.memory_space<vmem>>, vector<8x128xf32>,
    return
  }
  func.func @transform_0(%arg0: i32) -> (i32, i32) {
    %c0_i32 = arith.constant 0 : i32
    %c0_i32_0 = arith.constant 0 : i32
    %c0_i32_1 = arith.constant 0 : i32
    return %c0_i32, %c0_i32_0 : i32, i32
  }
  func.func @transform_1(%arg0: i32) -> (i32, i32) {
    %c0_i32 = arith.constant 0 : i32
    %c0_i32_0 = arith.constant 0 : i32
    %c0_i32_1 = arith.constant 0 : i32
    return %c0_i32, %c0_i32_0 : i32, i32
  }
  func.func @transform_2(%arg0: i32) -> (i32, i32) {
    %c0_i32 = arith.constant 0 : i32
    %c0_i32_0 = arith.constant 0 : i32
    %c0_i32_1 = arith.constant 0 : i32
    return %c0_i32, %c0_i32_0 : i32, i32
  }
  func.func @transform_3(%arg0: i32) -> (i32, i32) {
    %c0_i32 = arith.constant 0 : i32
    %c0_i32_0 = arith.constant 0 : i32
    %c0_i32_1 = arith.constant 0 : i32
    return %c0_i32, %c0_i32_0 : i32, i32
  }
  func.func @transform_4(%arg0: i32) -> (i32, i32) {
    %c0_i32 = arith.constant 0 : i32
    %c0_i32_0 = arith.constant 0 : i32
    %c0_i32_1 = arith.constant 0 : i32
    return %c0_i32, %c0_i32_0 : i32, i32
  }
  func.func @transform_5(%arg0: i32) -> (i32, i32) {
    %c0_i32 = arith.constant 0 : i32
    %c0_i32_0 = arith.constant 0 : i32
    %c0_i32_1 = arith.constant 0 : i32
    return %c0_i32, %c0_i32_0 : i32, i32
  }
}

</mosaic_0001>

<bundles_post_ra>
// kernel: tpu_custom_call.1
= control target key start
LH: loop header
LB: loop body
LE: loop exit
PB: predicated region body
PF: predicated region fallthrough
CT: control target
= control target key end

     0   :  { %10 = vsyncpa [#allocation3], 0  ;;  %s2192_s0 = inlined_call_operand.vmem [shape: f32[40,10], index: 0, kind: input, shape index: {}]   ;;  %s2193_s1 = inlined_call_operand.vmem [shape: f32[10,384], index: 1, kind: input, shape index: {}]   ;;  %s2194_s2 = inlined_call_operand.vmem [shape: f32[1,384], index: 2, kind: input, shape index: {}]   ;;  %s2195_s3 = inlined_call_operand.hbm [shape: f32[128,384], index: 3, kind: input, shape index: {}]   ;;  %s2196_s4 = inlined_call_operand.vmem [shape: f32[1,128], index: 4, kind: input, shape index: {}]   ;;  %s2197_s5 = inlined_call_operand.hbm [shape: f32[8,128], index: 5, kind: output, shape index: {}]  }
   0x1   :  { %11 = vsyncpa [#allocation4], 0  ;;  %s1570_s18 = smov [#allocation2]  }
   0x2   :  { %s23_s19 = sshll.u32 %s1570_s18, 4  ;;  %s24_s19 = int_to_ptr.vmem [resolvable:$true] %s23_s19 }
   0x3   :  { %s1534_s20 = scalar_lea.vmem %s24_s19, 6144  ;;  %p1539_p1 = scmp.lt.s32.totalorder %s24_s19, %s24_s19 }
   0x4   :  { %p1535_p0 = scmp.ne.s32.totalorder %s24_s19, %s1534_s20  ;;  %p1540_p2 = scmp.lt.s32.totalorder %s1534_s20, %s1534_s20 }
   0x6   :  { %p1541_p3 = por %p1540_p2, %p1539_p1 }
   0x8   :  { %p1542_p4 = pnand %p1541_p3, %p1535_p0 }
   0xa   :  { %1545 = shalt.err (!%p1542_p4)
}
   0xb   :  { %s1571_s21 = smov 384   ;;  %s1572_s22 = smov 24  }
   0xc   :  { %29 = dma.hbm_to_vmem [thread:$0]  %s2195_s3, 6144, %s24_s19, [#allocation3], %s1571_s21, %s1571_s21, %s1572_s22  }
   0xd   :  { %1566 = dma.done.wait [#allocation3], 6144  }
   0xe   :  { %1567 = vsyncadd [#allocation3], 4294961152  ;;  %v2198_v0 = vmov 0.0   ;;  %vm1574_vm0 = vmmov 0   ;;  %vm79_vm1 = vcmask 1041408   ;;  %v41_v3 = vld [vmem:[%s2193_s1 + $0x8] sm:$0xff]  ;;  %v48_v60 = vlaneseq }
   0xf   :  { %153 = vmatprep.mubr.f32.mxu0 %v2198_v0  ;;  %1276 = vmatprep.subr.mxu1 %v2198_v0  ;;  %v44_v1 = vld [vmem:[%s2193_s1 + $0x20] sm:$0x3]  ;;  %v43_v2 = vld [vmem:[%s2193_s1 + $0x18] sm:$0x3]  ;;  %vm63_vm2 = vcmask 80896   ;;  %v1632_v6 = vld [vmem:[#allocation2 + $0x170] sm:$0xff] }
  0x10   :  { %1280 = vmatprep.mubr.msk.f32.mxu1 %vm1574_vm0, %v2198_v0  ;;  %1160 = vmatprep.subr.msk.mxu0 %vm79_vm1, %v44_v1  ;;  %v40_v4 = vld [vmem:[%s2193_s1] sm:$0xff]  ;;  %2216 = vst [vmem:[#allocation8_spill] sm:$0xff] %v1632_v6  ;;  %v1634_v7 = vld [vmem:[#allocation2 + $0x168] sm:$0xff]  ;;  %v1636_v8 = vld [vmem:[#allocation2 + $0x158] sm:$0xff]  ;;  %v49_v61 = vshrl.u32 %v48_v60, 7 }
  0x11   :  { %1161 = vmatpush1.msk.msra.mxu0 %vm79_vm1, %v43_v2  ;;  %v1630_v5 = vld [vmem:[%s2192_s0] sm:$0xff]  ;;  %v1641_v9 = vld [vmem:[#allocation2 + $0x150] sm:$0xff]  ;;  %v1650_v11 = vld [vmem:[%s2192_s0 + $0x8] sm:$0xff] }
  0x12   :  { %119 = vmatprep.subr.mxu0 %v41_v3  ;;  %v1644_v10 = vld [vmem:[#allocation2 + $0x140] sm:$0xff]  ;;  %v1653_v12 = vld [vmem:[#allocation2 + $0x138] sm:$0xff]  ;;  %v1656_v13 = vld [vmem:[#allocation2 + $0x128] sm:$0xff]  ;;  %v50_v62 = vsub.s32 0, %v49_v61  ;;  %v54_v2 = vsub.s32 1, %v49_v61 }
  0x13   :  { %120 = vmatpush1.msra.mxu0 %v40_v4  ;;  %v1659_v14 = vld [vmem:[#allocation2 + $0x120] sm:$0xff]  ;;  %v1664_v15 = vld [vmem:[#allocation2 + $0x110] sm:$0xff]  ;;  %v1673_v17 = vld [vmem:[#allocation2 + $0x108] sm:$0xff] }
  0x14   :  { %1162 = vmatmul.mubr.msk.f32.vlgmr.msra.gmra.mxu0 %vm63_vm2, %v1630_v5  ;;  %329 = vmatprep.subr.mxu0 %v1632_v6  ;;  %v1670_v16 = vld [vmem:[%s2192_s0 + $0x10] sm:$0xff]  ;;  %v1676_v18 = vld [vmem:[#allocation2 + $0xf8] sm:$0xff]  ;;  %v45_v19 = vld [vmem:[%s2193_s1 + $0x28] sm:$0x3] }
  0x15   :  { %330 = vmatpush1.msra.mxu0 %v1634_v7  ;;  %159 = vmatprep.mubr.f32.mxu0 %v2198_v0  ;;  %v1682_v20 = vld [vmem:[#allocation2 + $0xf0] sm:$0xff]  ;;  %v1687_v21 = vld [vmem:[#allocation2 + $0xe0] sm:$0xff]  ;;  %v1693_v22 = vld [vmem:[%s2192_s0 + $0x18] sm:$0xff] }
  0x16   :  { %331 = vmatprep.subr.mxu0 %v1636_v8  ;;  %v1696_v23 = vld [vmem:[#allocation2 + $0xd8] sm:$0xff]  ;;  %1277 = vmatpush3.msk.msra.mxu1 %vm79_vm1, %v45_v19  ;;  %v1700_v24 = vld [vmem:[#allocation2 + $0xc8] sm:$0xff]  ;;  %v42_v25 = vld [vmem:[%s2193_s1 + $0x10] sm:$0xff] }
  0x17   :  { %332 = vmatpush1.msra.mxu0 %v1641_v9  ;;  %1278 = vmatprep.subr.mxu1 %v2198_v0  ;;  %v1707_v26 = vld [vmem:[#allocation2 + $0xc0] sm:$0xff]  ;;  %v1712_v27 = vld [vmem:[#allocation2 + $0xb0] sm:$0xff]  ;;  %v1721_v29 = vld [vmem:[#allocation2 + $0xa8] sm:$0xff] }
  0x18   :  { %333 = vmatprep.subr.mxu0 %v1644_v10  ;;  %1163 = vmatmul.mubr.msk.f32.gmra.mxu0 %vm63_vm2, %v1650_v11  ;;  %v1718_v28 = vld [vmem:[%s2192_s0 + $0x20] sm:$0xff]  ;;  %v1724_v30 = vld [vmem:[#allocation2 + $0x98] sm:$0xff]  ;;  %v1728_v31 = vld [vmem:[#allocation2 + $0x90] sm:$0xff] }
  0x19   :  { %334 = vmatpush1.msra.mxu0 %v1653_v12  ;;  %165 = vmatprep.mubr.f32.mxu0 %v2198_v0  ;;  %v1732_v32 = vld [vmem:[#allocation2 + $0x178] sm:$0xff]  ;;  %v1735_v33 = vld [vmem:[#allocation2 + $0x80] sm:$0xff]  ;;  %v1746_v36 = vld [vmem:[#allocation2 + $0x68] sm:$0xff] }
  0x1a   :  { %335 = vmatprep.subr.mxu0 %v1656_v13  ;;  %1279 = vmatpush3.msra.mxu1 %v42_v25  ;;  %v1740_v34 = vld [vmem:[#allocation2 + $0x78] sm:$0xff]  ;;  %v1743_v35 = vld [vmem:[#allocation2 + $0x160] sm:$0xff]  ;;  %v1753_v38 = vld [vmem:[#allocation2 + $0x148] sm:$0xff] }
  0x1b   :  { %336 = vmatpush1.msra.mxu0 %v1659_v14  ;;  %1295 = vmatprep.subr.mxu1 %v2198_v0  ;;  %v1750_v37 = vld [vmem:[#allocation2 + $0x60] sm:$0xff]  ;;  %v1756_v39 = vld [vmem:[#allocation2 + $0x50] sm:$0xff]  ;;  %v1760_v40 = vld [vmem:[#allocation2 + $0x48] sm:$0xff] }
  0x1c   :  { %337 = vmatprep.subr.mxu0 %v1664_v15  ;;  %1164 = vmatmul.mubr.msk.f32.gmra.mxu0 %vm63_vm2, %v1670_v16  ;;  %v1763_v41 = vld [vmem:[#allocation2 + $0x130] sm:$0xff]  ;;  %v1766_v42 = vld [vmem:[#allocation2 + $0x38] sm:$0xff]  ;;  %v1776_v45 = vld [vmem:[#allocation2 + $0x20] sm:$0xff] }
  0x1d   :  { %338 = vmatpush1.msra.mxu0 %v1673_v17  ;;  %171 = vmatprep.mubr.f32.mxu0 %v2198_v0  ;;  %v1770_v43 = vld [vmem:[#allocation2 + $0x30] sm:$0xff]  ;;  %v1773_v44 = vld [vmem:[#allocation2 + $0x118] sm:$0xff]  ;;  %2217 = vst [vmem:[#allocation9_spill] sm:$0xff] %v1776_v45  ;;  %v1783_v47 = vld [vmem:[#allocation2 + $0x100] sm:$0xff] }
  0x1e   :  { %339 = vmatprep.subr.mxu0 %v1676_v18  ;;  %1281 = vmatmul.mubr.msk.f32.vlgmr.msra.gmra.mxu1 %vm63_vm2, %v1630_v5  ;;  %v1780_v46 = vld [vmem:[#allocation2 + $0x18] sm:$0xff]  ;;  %v1786_v48 = vld [vmem:[#allocation2 + $0x8] sm:$0xff]  ;;  %v1790_v49 = vld [vmem:[#allocation2] sm:$0xff] }
  0x1f   :  { %340 = vmatpush1.msra.mxu0 %v1682_v20  ;;  %1296 = vmatpush3.msra.mxu1 %v1732_v32  ;;  %2218 = vst [vmem:[#allocation10_spill] sm:$0xff] %v1780_v46  ;;  %2219 = vst [vmem:[#allocation11_spill] sm:$0xff] %v1786_v48  ;;  %v1793_v50 = vld [vmem:[#allocation2 + $0xe8] sm:$0xff]  ;;  %v1799_v51 = vld [vmem:[#allocation2 + $0xd0] sm:$0xff] }
  0x20   :  { %341 = vmatprep.subr.mxu0 %v1687_v21  ;;  %1165 = vmatmul.mubr.msk.f32.gmra.mxu0 %vm63_vm2, %v1693_v22  ;;  %2220 = vst [vmem:[#allocation12_spill] sm:$0xff] %v1790_v49  ;;  %v1805_v52 = vld [vmem:[#allocation2 + $0xb8] sm:$0xff]  ;;  %v1813_v53 = vld [vmem:[#allocation2 + $0xa0] sm:$0xff]  ;;  %v1819_v54 = vld [vmem:[#allocation2 + $0x88] sm:$0xff] }
  0x21   :  { %342 = vmatpush1.msra.mxu0 %v1696_v23  ;;  %177 = vmatprep.mubr.f32.mxu0 %v2198_v0  ;;  %v1827_v55 = vld [vmem:[#allocation2 + $0x70] sm:$0xff]  ;;  %v1833_v56 = vld [vmem:[#allocation2 + $0x58] sm:$0xff]  ;;  %v1841_v57 = vld [vmem:[#allocation2 + $0x40] sm:$0xff] }
  0x22   :  { %343 = vmatprep.subr.mxu0 %v1700_v24  ;;  %1297 = vmatprep.subr.mxu1 %v2198_v0  ;;  %2221 = vst [vmem:[#allocation13_spill] sm:$0xff] %v1841_v57  ;;  %v1847_v58 = vld [vmem:[#allocation2 + $0x28] sm:$0xff]  ;;  %v1855_v59 = vld [vmem:[#allocation2 + $0x10] sm:$0xff]  ;;  %v46_v63 = vld [vmem:[%s2194_s2] sm:$0x7] }
  0x23   :  { %344 = vmatpush1.msra.mxu0 %v1707_v26  ;;  %1298 = vmatpush3.msra.mxu1 %v1743_v35  ;;  %2222 = vst [vmem:[#allocation14_spill] sm:$0xff] %v1847_v58  ;;  %2223 = vst [vmem:[#allocation15_spill] sm:$0xff] %v1855_v59  ;;  %v51_v4 = vrot.slane %v46_v63, %v50_v62 }
  0x24   :  { %345 = vmatprep.subr.mxu0 %v1712_v27  ;;  %1166 = vmatmul.mubr.msk.f32.gmra.mxu0 %vm63_vm2, %v1718_v28 }
  0x25   :  { %346 = vmatpush1.msra.mxu0 %v1721_v29  ;;  %393 = vmatprep.mubr.f32.mxu0 %v2198_v0 }
  0x26   :  { %347 = vmatprep.subr.mxu0 %v1724_v30  ;;  %1299 = vmatprep.subr.mxu1 %v2198_v0 }
  0x27   :  { %348 = vmatpush1.msra.mxu0 %v1728_v31  ;;  %1300 = vmatpush3.msra.mxu1 %v1753_v38 }
  0x28   :  { %349 = vmatprep.subr.mxu0 %v1735_v33  ;;  %1301 = vmatprep.subr.mxu1 %v2198_v0 }
  0x29   :  { %350 = vmatpush1.msra.mxu0 %v1740_v34  ;;  %1302 = vmatpush3.msra.mxu1 %v1763_v41 }
  0x2a   :  { %351 = vmatprep.subr.mxu0 %v1746_v36  ;;  %1303 = vmatprep.subr.mxu1 %v2198_v0 }
  0x2b   :  { %352 = vmatpush1.msra.mxu0 %v1750_v37  ;;  %1304 = vmatpush3.msra.mxu1 %v1773_v44 }
  0x2c   :  { %353 = vmatprep.subr.mxu0 %v1756_v39  ;;  %1305 = vmatprep.subr.mxu1 %v2198_v0 }
  0x2d   :  { %354 = vmatpush1.msra.mxu0 %v1760_v40  ;;  %1306 = vmatpush3.msra.mxu1 %v1783_v47 }
  0x2e   :  { %355 = vmatprep.subr.mxu0 %v1766_v42  ;;  %1307 = vmatprep.subr.mxu1 %v2198_v0 }
  0x2f   :  { %356 = vmatpush1.msra.mxu0 %v1770_v43  ;;  %1308 = vmatpush3.msra.mxu1 %v1793_v50 }
  0x30   :  { %357 = vmatprep.subr.mxu0 %v1776_v45  ;;  %1309 = vmatprep.subr.mxu1 %v2198_v0 }
  0x31   :  { %358 = vmatpush1.msra.mxu0 %v1780_v46  ;;  %1283 = vmatprep.mubr.msk.f32.mxu1 %vm1574_vm0, %v2198_v0 }
  0x32   :  { %359 = vmatprep.subr.mxu0 %v1786_v48  ;;  %1310 = vmatpush3.msra.mxu1 %v1799_v51 }
  0x33   :  { %360 = vmatpush1.msra.mxu0 %v1790_v49  ;;  %1284 = vmatmul.mubr.msk.f32.gmra.mxu1 %vm63_vm2, %v1650_v11  ;;  %v55_v11 = vrot.slane %v46_v63, %v54_v2 }
  0x34   :  { %394 = vmatmul.mubr.f32.vlgmr.msra.gmra.mxu0 %v2198_v0  ;;  %1311 = vmatprep.subr.mxu1 %v2198_v0 }
  0x35   :  { %1312 = vmatpush3.msra.mxu1 %v1805_v52  ;;  %1286 = vmatprep.mubr.msk.f32.mxu1 %vm1574_vm0, %v2198_v0 }
  0x36   :  { %1313 = vmatprep.subr.mxu1 %v2198_v0  ;;  %492 = vmatprep.subr.mxu0 %v1632_v6 }
  0x37   :  { %1314 = vmatpush3.msra.mxu1 %v1813_v53  ;;  %493 = vmatpush1.msra.mxu0 %v1634_v7 }
  0x38   :  { %1287 = vmatmul.mubr.msk.f32.gmra.mxu1 %vm63_vm2, %v1670_v16  ;;  %1315 = vmatprep.subr.mxu1 %v2198_v0 }
  0x39   :  { %1316 = vmatpush3.msra.mxu1 %v1819_v54  ;;  %1289 = vmatprep.mubr.msk.f32.mxu1 %vm1574_vm0, %v2198_v0 }
  0x3a   :  { %1317 = vmatprep.subr.mxu1 %v2198_v0  ;;  %494 = vmatprep.subr.mxu0 %v1636_v8 }
  0x3b   :  { %1318 = vmatpush3.msra.mxu1 %v1827_v55  ;;  %495 = vmatpush1.msra.mxu0 %v1641_v9 }
  0x3c   :  { %1290 = vmatmul.mubr.msk.f32.gmra.mxu1 %vm63_vm2, %v1693_v22  ;;  %1319 = vmatprep.subr.mxu1 %v2198_v0 }
  0x3d   :  { %1320 = vmatpush3.msra.mxu1 %v1833_v56  ;;  %1292 = vmatprep.mubr.msk.f32.mxu1 %vm1574_vm0, %v2198_v0 }
  0x3e   :  { %1321 = vmatprep.subr.mxu1 %v2198_v0  ;;  %496 = vmatprep.subr.mxu0 %v1644_v10 }
  0x3f   :  { %1322 = vmatpush3.msra.mxu1 %v1841_v57  ;;  %497 = vmatpush1.msra.mxu0 %v1653_v12 }
  0x40   :  { %1293 = vmatmul.mubr.msk.f32.gmra.mxu1 %vm63_vm2, %v1718_v28  ;;  %1323 = vmatprep.subr.mxu1 %v2198_v0 }
  0x41   :  { %1324 = vmatpush3.msra.mxu1 %v1847_v58  ;;  %1327 = vmatprep.mubr.msk.f32.mxu1 %vm1574_vm0, %v2198_v0 }
  0x42   :  { %1325 = vmatprep.subr.mxu1 %v2198_v0  ;;  %498 = vmatprep.subr.mxu0 %v1656_v13 }
  0x43   :  { %1326 = vmatpush3.msra.mxu1 %v1855_v59  ;;  %499 = vmatpush1.msra.mxu0 %v1659_v14 }
  0x44   :  { %1328 = vmatmul.mubr.f32.vlgmr.msra.gmra.mxu1 %v2198_v0  ;;  %1330 = vmatprep.subr.mxu1 %v2198_v0 }
  0x45   :  { %1331 = vmatpush3.msra.mxu1 %v1732_v32  ;;  %500 = vmatprep.subr.mxu0 %v1664_v15 }
  0x46   :  { %1332 = vmatprep.subr.mxu1 %v2198_v0  ;;  %501 = vmatpush1.msra.mxu0 %v1673_v17 }
  0x47   :  { %1333 = vmatpush3.msra.mxu1 %v1743_v35  ;;  %502 = vmatprep.subr.mxu0 %v1676_v18 }
  0x48   :  { %1334 = vmatprep.subr.mxu1 %v2198_v0  ;;  %503 = vmatpush1.msra.mxu0 %v1682_v20 }
  0x49   :  { %1335 = vmatpush3.msra.mxu1 %v1753_v38  ;;  %504 = vmatprep.subr.mxu0 %v1687_v21 }
  0x4a   :  { %1336 = vmatprep.subr.mxu1 %v2198_v0  ;;  %505 = vmatpush1.msra.mxu0 %v1696_v23 }
  0x4b   :  { %1337 = vmatpush3.msra.mxu1 %v1763_v41  ;;  %506 = vmatprep.subr.mxu0 %v1700_v24 }
  0x4c   :  { %1338 = vmatprep.subr.mxu1 %v2198_v0  ;;  %507 = vmatpush1.msra.mxu0 %v1707_v26 }
  0x4d   :  { %1339 = vmatpush3.msra.mxu1 %v1773_v44  ;;  %508 = vmatprep.subr.mxu0 %v1712_v27 }
  0x4e   :  { %1340 = vmatprep.subr.mxu1 %v2198_v0  ;;  %509 = vmatpush1.msra.mxu0 %v1721_v29 }
  0x4f   :  { %1341 = vmatpush3.msra.mxu1 %v1783_v47  ;;  %510 = vmatprep.subr.mxu0 %v1724_v30 }
  0x50   :  { %1342 = vmatprep.subr.mxu1 %v2198_v0  ;;  %511 = vmatpush1.msra.mxu0 %v1728_v31 }
  0x51   :  { %1343 = vmatpush3.msra.mxu1 %v1793_v50  ;;  %512 = vmatprep.subr.mxu0 %v1735_v33 }
  0x52   :  { %1344 = vmatprep.subr.mxu1 %v2198_v0  ;;  %513 = vmatpush1.msra.mxu0 %v1740_v34 }
  0x53   :  { %1345 = vmatpush3.msra.mxu1 %v1799_v51  ;;  %514 = vmatprep.subr.mxu0 %v1746_v36 }
  0x54   :  { %1346 = vmatprep.subr.mxu1 %v2198_v0  ;;  %515 = vmatpush1.msra.mxu0 %v1750_v37 }
  0x55   :  { %1347 = vmatpush3.msra.mxu1 %v1805_v52  ;;  %516 = vmatprep.subr.mxu0 %v1756_v39 }
  0x56   :  { %1348 = vmatprep.subr.mxu1 %v2198_v0  ;;  %517 = vmatpush1.msra.mxu0 %v1760_v40 }
  0x57   :  { %1349 = vmatpush3.msra.mxu1 %v1813_v53  ;;  %518 = vmatprep.subr.mxu0 %v1766_v42 }
  0x58   :  { %1350 = vmatprep.subr.mxu1 %v2198_v0  ;;  %519 = vmatpush1.msra.mxu0 %v1770_v43 }
  0x59   :  { %1351 = vmatpush3.msra.mxu1 %v1819_v54  ;;  %520 = vmatprep.subr.mxu0 %v1776_v45 }
  0x5a   :  { %1352 = vmatprep.subr.mxu1 %v2198_v0  ;;  %521 = vmatpush1.msra.mxu0 %v1780_v46 }
  0x5b   :  { %1353 = vmatpush3.msra.mxu1 %v1827_v55  ;;  %522 = vmatprep.subr.mxu0 %v1786_v48 }
  0x5c   :  { %1354 = vmatprep.subr.mxu1 %v2198_v0  ;;  %523 = vmatpush1.msra.mxu0 %v1790_v49 }
  0x5d   :  { %1355 = vmatpush3.msra.mxu1 %v1833_v56  ;;  %556 = vmatprep.mubr.f32.mxu0 %v2198_v0 }
  0x5e   :  { %1356 = vmatprep.subr.mxu1 %v2198_v0  ;;  %1362 = vmatprep.mubr.msk.f32.mxu1 %vm1574_vm0, %v2198_v0 }
  0x5f   :  { %1357 = vmatpush3.msra.mxu1 %v1841_v57  ;;  %655 = vmatprep.subr.mxu0 %v1632_v6 }
  0x60   :  { %1358 = vmatprep.subr.mxu1 %v2198_v0 }
  0x61   :  { %1359 = vmatpush3.msra.mxu1 %v1847_v58 }
  0x62   :  { %1360 = vmatprep.subr.mxu1 %v2198_v0 }
  0x63   :  { %1361 = vmatpush3.msra.mxu1 %v1855_v59 }
  0x64   :  { %1365 = vmatprep.subr.mxu1 %v2198_v0 }
  0xd4   :  { %v155_v1 = vpop.f32.mrf.mxu0 }
  0xd6   :  { %v157_v3 = vpop.f32.mrf.mxu0 }
  0xd8   :  { %v161_v5 = vpop.f32.mrf.mxu0 }
  0xd9   :  { %v1929_v16 = vadd.f32 %v161_v5, %v51_v4 }
  0xda   :  { %v163_v19 = vpop.f32.mrf.mxu0 }
  0xdb   :  { %2224 = vst [vmem:[#allocation16_spill] sm:$0xff] %v1929_v16  ;;  %v1931_v22 = vadd.f32 %v163_v19, %v55_v11 }
  0xdc   :  { %v167_v25 = vpop.f32.mrf.mxu0 }
  0xdd   :  { %2225 = vst [vmem:[#allocation17_spill] sm:$0xff] %v1931_v22  ;;  %v1933_v28 = vadd.f32 %v167_v25, %v51_v4  ;;  %v58_v22 = vsub.s32 2, %v49_v61  ;;  %v156_v25 = vadd.f32 %v155_v1, %v51_v4 }
  0xde   :  { %v169_v60 = vpop.f32.mrf.mxu0  ;;  %v250_v2 = vpop.f32.mrf.mxu1 }
  0xdf   :  { %2226 = vst [vmem:[#allocation18_spill] sm:$0xff] %v1933_v28  ;;  %v1935_v0 = vadd.f32 %v169_v60, %v55_v11  ;;  %v59_v46 = vrot.slane %v46_v63, %v58_v22 }
  0xe0   :  { %v173_v6 = vpop.f32.mrf.mxu0  ;;  %v1282_v19 = vpop.f32.mrf.mxu1 }
  0xe1   :  { %2227 = vst [vmem:[#allocation19_spill] sm:$0xff] %v1935_v0  ;;  %v1937_v59 = vadd.f32 %v173_v6, %v51_v4 }
  0xe2   :  { %v175_v49 = vpop.f32.mrf.mxu0 }
  0xe3   :  { %2228 = vst [vmem:[#allocation20_spill] sm:$0xff] %v1937_v59  ;;  %v1939_v48 = vadd.f32 %v175_v49, %v55_v11 }
  0xe4   :  { %v179_v62 = vpop.f32.mrf.mxu0 }
  0xe5   :  { %2229 = vst [vmem:[#allocation21_spill] sm:$0xff] %v1939_v48  ;;  %v1941_v58 = vadd.f32 %v179_v62, %v51_v4  ;;  %v158_v48 = vadd.f32 %v157_v3, %v55_v11 }
  0xe6   :  { %v181_v5 = vpop.f32.mrf.mxu0 }
  0xe7   :  { %2230 = vst [vmem:[#allocation22_spill] sm:$0xff] %v1941_v58  ;;  %v1943_v16 = vadd.f32 %v181_v5, %v55_v11 }
  0xe9   :  { %2231 = vst [vmem:[#allocation23_spill] sm:$0xff] %v1943_v16 }
  0xf3   :  { %v255_v0 = vpop.f32.mrf.mxu1 }
  0xf4   :  { %v395_v28 = vpop.f32.mrf.mxu0  ;;  %v1945_v6 = vadd.f32 %v255_v0, %v59_v46 }
  0xf5   :  { %v470_v60 = vadd.f32 %v395_v28, %v156_v25  ;;  %v1285_v49 = vpop.f32.mrf.mxu1 }
  0xf6   :  { %v397_v59 = vpop.f32.mrf.mxu0 }
  0xf7   :  { %v1174_v45 = vmul.f32 -1.442695, %v470_v60  ;;  %v477_v58 = vadd.f32 %v397_v59, %v158_v48  ;;  %v1956_v48 = vld [vmem:[%s2196_s4] ss:$0 sm:$0xff]  ;;  %s1575_s4 = smov [#allocation5]  }
  0xf8   :  { %v260_v62 = vpop.f32.mrf.mxu1  ;;  %s1151_s22 = sshll.u32 %s1575_s4, 4  ;;  %s1152_s22 = int_to_ptr.vmem [resolvable:$true] %s1151_s22 }
  0xf9   :  { %1476 = vpow2.f32 %v1174_v45  ;;  %v1947_v57 = vadd.f32 %v260_v62, %v59_v46  ;;  %v1175_v19 = vmul.f32 -1.442695, %v477_v58  ;;  %s1546_s23 = scalar_lea.vmem %s1152_s22, 128  ;;  %p1551_p6 = scmp.lt.s32.totalorder %s1152_s22, %s1152_s22 }
  0xfa   :  { %v1288_v5 = vpop.f32.mrf.mxu1  ;;  %p1547_p5 = scmp.ne.s32.totalorder %s1152_s22, %s1546_s23  ;;  %p1552_p7 = scmp.lt.s32.totalorder %s1546_s23, %s1546_s23 }
  0xfb   :  { %2232 = vst [vmem:[#allocation24_spill] sm:$0xff] %v1947_v57  ;;  %1478 = vpow2.f32 %v1175_v19 }
  0xfc   :  { %v265_v16 = vpop.f32.mrf.mxu1  ;;  %p1553_p8 = por %p1552_p7, %p1551_p6 }
  0xfd   :  { %v1949_v61 = vadd.f32 %v265_v16, %v59_v46  ;;  %v251_v16 = vadd.f32 %v250_v2, %v59_v46  ;;  %v2236_v2 = vld [vmem:[#allocation13_spill] sm:$0xff] }
  0xfe   :  { %v1291_v1 = vpop.f32.mrf.mxu1  ;;  %p1554_p9 = pnand %p1553_p8, %p1547_p5 }
  0xff   :  { %2233 = vst [vmem:[#allocation25_spill] sm:$0xff] %v1949_v61 }
 0x100   :  { %v270_v63 = vpop.f32.mrf.mxu1 }
 0x101   :  { %v1951_v4 = vadd.f32 %v270_v63, %v59_v46  ;;  %v2235_v46 = vmov 0.0  }
 0x102   :  { %v1294_v0 = vpop.f32.mrf.mxu1 }
 0x103   :  { %2234 = vst [vmem:[#allocation26_spill] sm:$0xff] %v1951_v4 }
 0x104   :  { %v466_v28 = vpop.f32.mrf.mxu1 }
 0x105   :  { %v484_v59 = vadd.f32 %v1956_v48, %v466_v28  ;;  %v2238_v28 = vld [vmem:[#allocation10_spill] sm:$0xff] }
 0x106   :  { %v1477_v22 = vpop.eup %1476  ;;  %v1329_v3 = vpop.f32.mrf.mxu1 }
 0x107   :  { %v474_v25 = vadd.f32 1.0, %v1477_v22  ;;  %v2237_v22 = vld [vmem:[#allocation9_spill] sm:$0xff]  ;;  %v2240_v3 = vld [vmem:[#allocation11_spill] sm:$0xff] }
 0x108   :  { %v1479_v45 = vpop.eup %1478 }
 0x109   :  { %1480 = vrcp.f32 %v474_v25  ;;  %v481_v58 = vadd.f32 1.0, %v1479_v45  ;;  %v2239_v25 = vld [vmem:[#allocation14_spill] sm:$0xff]  ;;  %v2241_v45 = vld [vmem:[#allocation12_spill] sm:$0xff] }
 0x10b   :  { %1482 = vrcp.f32 %v481_v58  ;;  %v2242_v58 = vld [vmem:[#allocation15_spill] sm:$0xff] }
 0x116   :  { %v1481_v11 = vpop.eup %1480 }
 0x117   :  { %v485_v60 = vmul.f32 %v1481_v11, %v484_v59  ;;  %v2243_v59 = vld [vmem:[#allocation8_spill] sm:$0xff] }
 0x118   :  { %v1483_v62 = vpop.eup %1482 }
 0x119   :  { %v486_v49 = vadd.f32 %v485_v60, %v251_v16  ;;  %v488_v5 = vsub.f32 1.0, %v1483_v62  ;;  %v490_v63 = vmul.f32 0.0, %v1483_v62  ;;  %v2244_v60 = vld [vmem:[#allocation16_spill] sm:$0xff] }
 0x11b   :  { %1484 = vtanh.f32 %v486_v49 }
 0x128   :  { %v1485_v19 = vpop.eup %1484 }
 0x129   :  { %v489_v1 = vmul.f32 %v1485_v19, %v488_v5 }
 0x12b   :  { %v1959_v0 = vadd.f32 %v490_v63, %v489_v1  ;;  %v2245_v1 = vld [vmem:[#allocation17_spill] sm:$0xff] }
 0x12d   :  { %557 = vmatmul.mubr.f32.vlgmr.msra.gmra.mxu0 %v1959_v0  ;;  %1363 = vmatmul.mubr.f32.vlgmr.msra.gmra.mxu1 %v1959_v0 }
 0x12e   :  { %656 = vmatpush1.msra.mxu0 %v1634_v7  ;;  %1366 = vmatpush3.msra.mxu1 %v1732_v32 }
 0x12f   :  { %657 = vmatprep.subr.mxu0 %v1636_v8  ;;  %1367 = vmatprep.subr.mxu1 %v2235_v46 }
 0x130   :  { %658 = vmatpush1.msra.mxu0 %v1641_v9  ;;  %1368 = vmatpush3.msra.mxu1 %v1743_v35 }
 0x131   :  { %659 = vmatprep.subr.mxu0 %v1644_v10  ;;  %1369 = vmatprep.subr.mxu1 %v2235_v46 }
 0x132   :  { %660 = vmatpush1.msra.mxu0 %v1653_v12  ;;  %1370 = vmatpush3.msra.mxu1 %v1753_v38 }
 0x133   :  { %661 = vmatprep.subr.mxu0 %v1656_v13  ;;  %1371 = vmatprep.subr.mxu1 %v2235_v46 }
 0x134   :  { %662 = vmatpush1.msra.mxu0 %v1659_v14  ;;  %1372 = vmatpush3.msra.mxu1 %v1763_v41 }
 0x135   :  { %663 = vmatprep.subr.mxu0 %v1664_v15  ;;  %1373 = vmatprep.subr.mxu1 %v2235_v46 }
 0x136   :  { %664 = vmatpush1.msra.mxu0 %v1673_v17  ;;  %1374 = vmatpush3.msra.mxu1 %v1773_v44 }
 0x137   :  { %665 = vmatprep.subr.mxu0 %v1676_v18  ;;  %1375 = vmatprep.subr.mxu1 %v2235_v46 }
 0x138   :  { %666 = vmatpush1.msra.mxu0 %v1682_v20  ;;  %1376 = vmatpush3.msra.mxu1 %v1783_v47 }
 0x139   :  { %667 = vmatprep.subr.mxu0 %v1687_v21  ;;  %1377 = vmatprep.subr.mxu1 %v2235_v46 }
 0x13a   :  { %668 = vmatpush1.msra.mxu0 %v1696_v23  ;;  %1378 = vmatpush3.msra.mxu1 %v1793_v50 }
 0x13b   :  { %669 = vmatprep.subr.mxu0 %v1700_v24  ;;  %1379 = vmatprep.subr.mxu1 %v2235_v46 }
 0x13c   :  { %670 = vmatpush1.msra.mxu0 %v1707_v26  ;;  %1380 = vmatpush3.msra.mxu1 %v1799_v51 }
 0x13d   :  { %671 = vmatprep.subr.mxu0 %v1712_v27  ;;  %1381 = vmatprep.subr.mxu1 %v2235_v46 }
 0x13e   :  { %672 = vmatpush1.msra.mxu0 %v1721_v29  ;;  %1382 = vmatpush3.msra.mxu1 %v1805_v52 }
 0x13f   :  { %673 = vmatprep.subr.mxu0 %v1724_v30  ;;  %1383 = vmatprep.subr.mxu1 %v2235_v46 }
 0x140   :  { %674 = vmatpush1.msra.mxu0 %v1728_v31  ;;  %1384 = vmatpush3.msra.mxu1 %v1813_v53 }
 0x141   :  { %675 = vmatprep.subr.mxu0 %v1735_v33  ;;  %1385 = vmatprep.subr.mxu1 %v2235_v46 }
 0x142   :  { %676 = vmatpush1.msra.mxu0 %v1740_v34  ;;  %1386 = vmatpush3.msra.mxu1 %v1819_v54 }
 0x143   :  { %677 = vmatprep.subr.mxu0 %v1746_v36  ;;  %1387 = vmatprep.subr.mxu1 %v2235_v46 }
 0x144   :  { %678 = vmatpush1.msra.mxu0 %v1750_v37  ;;  %1388 = vmatpush3.msra.mxu1 %v1827_v55 }
 0x145   :  { %679 = vmatprep.subr.mxu0 %v1756_v39  ;;  %1389 = vmatprep.subr.mxu1 %v2235_v46 }
 0x146   :  { %680 = vmatpush1.msra.mxu0 %v1760_v40  ;;  %1390 = vmatpush3.msra.mxu1 %v1833_v56 }
 0x147   :  { %681 = vmatprep.subr.mxu0 %v1766_v42  ;;  %1391 = vmatprep.subr.mxu1 %v2235_v46 }
 0x148   :  { %682 = vmatpush1.msra.mxu0 %v1770_v43  ;;  %1392 = vmatpush3.msra.mxu1 %v2236_v2 }
 0x149   :  { %683 = vmatprep.subr.mxu0 %v2237_v22  ;;  %1393 = vmatprep.subr.mxu1 %v2235_v46 }
 0x14a   :  { %684 = vmatpush1.msra.mxu0 %v2238_v28  ;;  %1394 = vmatpush3.msra.mxu1 %v2239_v25 }
 0x14b   :  { %685 = vmatprep.subr.mxu0 %v2240_v3  ;;  %1395 = vmatprep.subr.mxu1 %v2235_v46 }
 0x14c   :  { %686 = vmatpush1.msra.mxu0 %v2241_v45  ;;  %719 = vmatprep.mubr.f32.mxu0 %v2235_v46 }
 0x14d   :  { %1396 = vmatpush3.msra.mxu1 %v2242_v58  ;;  %1397 = vmatprep.mubr.msk.f32.mxu1 %vm1574_vm0, %v2235_v46 }
 0x14e   :  { %818 = vmatprep.subr.mxu0 %v2243_v59  ;;  %1400 = vmatprep.subr.mxu1 %v2235_v46 }
 0x1ed   :  { %v558_v11 = vpop.f32.mrf.mxu0  ;;  %v629_v16 = vpop.f32.mrf.mxu1 }
 0x1ee   :  { %v633_v49 = vadd.f32 %v558_v11, %v2244_v60  ;;  %v647_v59 = vadd.f32 %v1956_v48, %v629_v16 }
 0x1ef   :  { %v1364_v62 = vpop.f32.mrf.mxu1  ;;  %v560_v19 = vpop.f32.mrf.mxu0 }
 0x1f0   :  { %v1176_v5 = vmul.f32 -1.442695, %v633_v49  ;;  %v640_v63 = vadd.f32 %v560_v19, %v2245_v1 }
 0x1f2   :  { %1486 = vpow2.f32 %v1176_v5  ;;  %v1177_v4 = vmul.f32 -1.442695, %v640_v63 }
 0x1f4   :  { %1488 = vpow2.f32 %v1177_v4 }
 0x1ff   :  { %v1487_v61 = vpop.eup %1486 }
 0x200   :  { %v637_v57 = vadd.f32 1.0, %v1487_v61  ;;  %v2248_v61 = vld [vmem:[#allocation12_spill] sm:$0xff] }
 0x201   :  { %v1489_v58 = vpop.eup %1488 }
 0x202   :  { %1490 = vrcp.f32 %v637_v57  ;;  %v644_v45 = vadd.f32 1.0, %v1489_v58  ;;  %v2246_v57 = vld [vmem:[#allocation14_spill] sm:$0xff] }
 0x203   :  { %v2251_v58 = vld [vmem:[#allocation18_spill] sm:$0xff] }
 0x204   :  { %1492 = vrcp.f32 %v644_v45 }
 0x20f   :  { %v1491_v3 = vpop.eup %1490 }
 0x210   :  { %v648_v25 = vmul.f32 %v1491_v3, %v647_v59 }
 0x211   :  { %v1493_v60 = vpop.eup %1492 }
 0x212   :  { %v649_v11 = vadd.f32 %v648_v25, %v1945_v6  ;;  %v651_v49 = vsub.f32 1.0, %v1493_v60  ;;  %v653_v19 = vmul.f32 %v1493_v60, %v1959_v0  ;;  %v2247_v6 = vld [vmem:[#allocation11_spill] sm:$0xff]  ;;  %v2250_v25 = vld [vmem:[#allocation8_spill] sm:$0xff] }
 0x213   :  { %v2249_v0 = vld [vmem:[#allocation15_spill] sm:$0xff] }
 0x214   :  { %1494 = vtanh.f32 %v649_v11  ;;  %v2252_v11 = vld [vmem:[#allocation19_spill] sm:$0xff] }
 0x221   :  { %v1495_v62 = vpop.eup %1494 }
 0x222   :  { %v652_v5 = vmul.f32 %v1495_v62, %v651_v49 }
 0x224   :  { %v2035_v4 = vadd.f32 %v653_v19, %v652_v5 }
 0x226   :  { %720 = vmatmul.mubr.f32.vlgmr.msra.gmra.mxu0 %v2035_v4  ;;  %1398 = vmatmul.mubr.f32.vlgmr.msra.gmra.mxu1 %v2035_v4 }
 0x227   :  { %819 = vmatpush1.msra.mxu0 %v1634_v7  ;;  %1401 = vmatpush3.msra.mxu1 %v1732_v32 }
 0x228   :  { %820 = vmatprep.subr.mxu0 %v1636_v8  ;;  %1402 = vmatprep.subr.mxu1 %v2235_v46 }
 0x229   :  { %821 = vmatpush1.msra.mxu0 %v1641_v9  ;;  %1403 = vmatpush3.msra.mxu1 %v1743_v35 }
 0x22a   :  { %822 = vmatprep.subr.mxu0 %v1644_v10  ;;  %1404 = vmatprep.subr.mxu1 %v2235_v46 }
 0x22b   :  { %823 = vmatpush1.msra.mxu0 %v1653_v12  ;;  %1405 = vmatpush3.msra.mxu1 %v1753_v38 }
 0x22c   :  { %824 = vmatprep.subr.mxu0 %v1656_v13  ;;  %1406 = vmatprep.subr.mxu1 %v2235_v46 }
 0x22d   :  { %825 = vmatpush1.msra.mxu0 %v1659_v14  ;;  %1407 = vmatpush3.msra.mxu1 %v1763_v41 }
 0x22e   :  { %826 = vmatprep.subr.mxu0 %v1664_v15  ;;  %1408 = vmatprep.subr.mxu1 %v2235_v46 }
 0x22f   :  { %827 = vmatpush1.msra.mxu0 %v1673_v17  ;;  %1409 = vmatpush3.msra.mxu1 %v1773_v44 }
 0x230   :  { %828 = vmatprep.subr.mxu0 %v1676_v18  ;;  %1410 = vmatprep.subr.mxu1 %v2235_v46 }
 0x231   :  { %829 = vmatpush1.msra.mxu0 %v1682_v20  ;;  %1411 = vmatpush3.msra.mxu1 %v1783_v47 }
 0x232   :  { %830 = vmatprep.subr.mxu0 %v1687_v21  ;;  %1412 = vmatprep.subr.mxu1 %v2235_v46 }
 0x233   :  { %831 = vmatpush1.msra.mxu0 %v1696_v23  ;;  %1413 = vmatpush3.msra.mxu1 %v1793_v50 }
 0x234   :  { %832 = vmatprep.subr.mxu0 %v1700_v24  ;;  %1414 = vmatprep.subr.mxu1 %v2235_v46 }
 0x235   :  { %833 = vmatpush1.msra.mxu0 %v1707_v26  ;;  %1415 = vmatpush3.msra.mxu1 %v1799_v51 }
 0x236   :  { %834 = vmatprep.subr.mxu0 %v1712_v27  ;;  %1416 = vmatprep.subr.mxu1 %v2235_v46 }
 0x237   :  { %835 = vmatpush1.msra.mxu0 %v1721_v29  ;;  %1417 = vmatpush3.msra.mxu1 %v1805_v52 }
 0x238   :  { %836 = vmatprep.subr.mxu0 %v1724_v30  ;;  %1418 = vmatprep.subr.mxu1 %v2235_v46 }
 0x239   :  { %837 = vmatpush1.msra.mxu0 %v1728_v31  ;;  %1419 = vmatpush3.msra.mxu1 %v1813_v53 }
 0x23a   :  { %838 = vmatprep.subr.mxu0 %v1735_v33  ;;  %1420 = vmatprep.subr.mxu1 %v2235_v46 }
 0x23b   :  { %839 = vmatpush1.msra.mxu0 %v1740_v34  ;;  %1421 = vmatpush3.msra.mxu1 %v1819_v54 }
 0x23c   :  { %840 = vmatprep.subr.mxu0 %v1746_v36  ;;  %1422 = vmatprep.subr.mxu1 %v2235_v46 }
 0x23d   :  { %841 = vmatpush1.msra.mxu0 %v1750_v37  ;;  %1423 = vmatpush3.msra.mxu1 %v1827_v55 }
 0x23e   :  { %842 = vmatprep.subr.mxu0 %v1756_v39  ;;  %1424 = vmatprep.subr.mxu1 %v2235_v46 }
 0x23f   :  { %843 = vmatpush1.msra.mxu0 %v1760_v40  ;;  %1425 = vmatpush3.msra.mxu1 %v1833_v56 }
 0x240   :  { %844 = vmatprep.subr.mxu0 %v1766_v42  ;;  %1426 = vmatprep.subr.mxu1 %v2235_v46 }
 0x241   :  { %845 = vmatpush1.msra.mxu0 %v1770_v43  ;;  %1427 = vmatpush3.msra.mxu1 %v2236_v2 }
 0x242   :  { %846 = vmatprep.subr.mxu0 %v2237_v22  ;;  %1428 = vmatprep.subr.mxu1 %v2235_v46 }
 0x243   :  { %847 = vmatpush1.msra.mxu0 %v2238_v28  ;;  %1429 = vmatpush3.msra.mxu1 %v2246_v57  ;;  %v2253_v57 = vld [vmem:[#allocation24_spill] sm:$0xff] }
 0x244   :  { %848 = vmatprep.subr.mxu0 %v2247_v6  ;;  %1430 = vmatprep.subr.mxu1 %v2235_v46 }
 0x245   :  { %849 = vmatpush1.msra.mxu0 %v2248_v61  ;;  %882 = vmatprep.mubr.f32.mxu0 %v2235_v46 }
 0x246   :  { %1431 = vmatpush3.msra.mxu1 %v2249_v0  ;;  %1432 = vmatprep.mubr.msk.f32.mxu1 %vm1574_vm0, %v2235_v46 }
 0x247   :  { %981 = vmatprep.subr.mxu0 %v2250_v25  ;;  %1435 = vmatprep.subr.mxu1 %v2235_v46 }
 0x2e6   :  { %v721_v3 = vpop.f32.mrf.mxu0  ;;  %v792_v45 = vpop.f32.mrf.mxu1 }
 0x2e7   :  { %v796_v59 = vadd.f32 %v721_v3, %v2251_v58  ;;  %v810_v25 = vadd.f32 %v1956_v48, %v792_v45 }
 0x2e8   :  { %v1399_v16 = vpop.f32.mrf.mxu1  ;;  %v723_v63 = vpop.f32.mrf.mxu0 }
 0x2e9   :  { %v1178_v1 = vmul.f32 -1.442695, %v796_v59  ;;  %v803_v60 = vadd.f32 %v723_v63, %v2252_v11 }
 0x2eb   :  { %1496 = vpow2.f32 %v1178_v1  ;;  %v1179_v49 = vmul.f32 -1.442695, %v803_v60 }
 0x2ed   :  { %1498 = vpow2.f32 %v1179_v49 }
 0x2f8   :  { %v1497_v62 = vpop.eup %1496 }
 0x2f9   :  { %v800_v5 = vadd.f32 1.0, %v1497_v62 }
 0x2fa   :  { %v1499_v19 = vpop.eup %1498 }
 0x2fb   :  { %1500 = vrcp.f32 %v800_v5  ;;  %v807_v0 = vadd.f32 1.0, %v1499_v19 }
 0x2fd   :  { %1502 = vrcp.f32 %v807_v0 }
 0x308   :  { %v1501_v61 = vpop.eup %1500 }
 0x309   :  { %v811_v6 = vmul.f32 %v1501_v61, %v810_v25 }
 0x30a   :  { %v1503_v58 = vpop.eup %1502 }
 0x30b   :  { %v812_v3 = vadd.f32 %v811_v6, %v2253_v57  ;;  %v814_v59 = vsub.f32 1.0, %v1503_v58  ;;  %v816_v63 = vmul.f32 %v1503_v58, %v2035_v4  ;;  %v2263_v6 = vld [vmem:[#allocation26_spill] sm:$0xff] }
 0x30d   :  { %1504 = vtanh.f32 %v812_v3 }
 0x31a   :  { %v1505_v16 = vpop.eup %1504 }
 0x31b   :  { %v815_v1 = vmul.f32 %v1505_v16, %v814_v59 }
 0x31d   :  { %v2111_v11 = vadd.f32 %v816_v63, %v815_v1 }
 0x31f   :  { %883 = vmatmul.mubr.f32.vlgmr.msra.gmra.mxu0 %v2111_v11  ;;  %1433 = vmatmul.mubr.f32.vlgmr.msra.gmra.mxu1 %v2111_v11 }
 0x320   :  { %982 = vmatpush1.msra.mxu0 %v1634_v7  ;;  %1436 = vmatpush3.msra.mxu1 %v1732_v32  ;;  %v2254_v7 = vld [vmem:[#allocation14_spill] sm:$0xff] }
 0x321   :  { %983 = vmatprep.subr.mxu0 %v1636_v8  ;;  %1437 = vmatprep.subr.mxu1 %v2235_v46  ;;  %v2255_v8 = vld [vmem:[#allocation11_spill] sm:$0xff] }
 0x322   :  { %984 = vmatpush1.msra.mxu0 %v1641_v9  ;;  %1438 = vmatpush3.msra.mxu1 %v1743_v35  ;;  %v2256_v9 = vld [vmem:[#allocation12_spill] sm:$0xff] }
 0x323   :  { %985 = vmatprep.subr.mxu0 %v1644_v10  ;;  %1439 = vmatprep.subr.mxu1 %v2235_v46  ;;  %v2257_v10 = vld [vmem:[#allocation15_spill] sm:$0xff] }
 0x324   :  { %986 = vmatpush1.msra.mxu0 %v1653_v12  ;;  %1440 = vmatpush3.msra.mxu1 %v1753_v38 }
 0x325   :  { %987 = vmatprep.subr.mxu0 %v1656_v13  ;;  %1441 = vmatprep.subr.mxu1 %v2235_v46 }
 0x326   :  { %988 = vmatpush1.msra.mxu0 %v1659_v14  ;;  %1442 = vmatpush3.msra.mxu1 %v1763_v41  ;;  %v2258_v14 = vld [vmem:[#allocation20_spill] sm:$0xff] }
 0x327   :  { %989 = vmatprep.subr.mxu0 %v1664_v15  ;;  %1443 = vmatprep.subr.mxu1 %v2235_v46 }
 0x328   :  { %990 = vmatpush1.msra.mxu0 %v1673_v17  ;;  %1444 = vmatpush3.msra.mxu1 %v1773_v44  ;;  %v2261_v44 = vld [vmem:[#allocation22_spill] sm:$0xff] }
 0x329   :  { %991 = vmatprep.subr.mxu0 %v1676_v18  ;;  %1445 = vmatprep.subr.mxu1 %v2235_v46 }
 0x32a   :  { %992 = vmatpush1.msra.mxu0 %v1682_v20  ;;  %1446 = vmatpush3.msra.mxu1 %v1783_v47 }
 0x32b   :  { %993 = vmatprep.subr.mxu0 %v1687_v21  ;;  %1447 = vmatprep.subr.mxu1 %v2235_v46  ;;  %v2259_v21 = vld [vmem:[#allocation21_spill] sm:$0xff] }
 0x32c   :  { %994 = vmatpush1.msra.mxu0 %v1696_v23  ;;  %1448 = vmatpush3.msra.mxu1 %v1793_v50 }
 0x32d   :  { %995 = vmatprep.subr.mxu0 %v1700_v24  ;;  %1449 = vmatprep.subr.mxu1 %v2235_v46 }
 0x32e   :  { %996 = vmatpush1.msra.mxu0 %v1707_v26  ;;  %1450 = vmatpush3.msra.mxu1 %v1799_v51 }
 0x32f   :  { %997 = vmatprep.subr.mxu0 %v1712_v27  ;;  %1451 = vmatprep.subr.mxu1 %v2235_v46 }
 0x330   :  { %998 = vmatpush1.msra.mxu0 %v1721_v29  ;;  %1452 = vmatpush3.msra.mxu1 %v1805_v52 }
 0x331   :  { %999 = vmatprep.subr.mxu0 %v1724_v30  ;;  %1453 = vmatprep.subr.mxu1 %v2235_v46 }
 0x332   :  { %1000 = vmatpush1.msra.mxu0 %v1728_v31  ;;  %1454 = vmatpush3.msra.mxu1 %v1813_v53  ;;  %v2262_v53 = vld [vmem:[#allocation23_spill] sm:$0xff] }
 0x333   :  { %1001 = vmatprep.subr.mxu0 %v1735_v33  ;;  %1455 = vmatprep.subr.mxu1 %v2235_v46 }
 0x334   :  { %1002 = vmatpush1.msra.mxu0 %v1740_v34  ;;  %1456 = vmatpush3.msra.mxu1 %v1819_v54  ;;  %v2260_v34 = vld [vmem:[#allocation25_spill] sm:$0xff] }
 0x335   :  { %1003 = vmatprep.subr.mxu0 %v1746_v36  ;;  %1457 = vmatprep.subr.mxu1 %v2235_v46 }
 0x336   :  { %1004 = vmatpush1.msra.mxu0 %v1750_v37  ;;  %1458 = vmatpush3.msra.mxu1 %v1827_v55 }
 0x337   :  { %1005 = vmatprep.subr.mxu0 %v1756_v39  ;;  %1459 = vmatprep.subr.mxu1 %v2235_v46 }
 0x338   :  { %1006 = vmatpush1.msra.mxu0 %v1760_v40  ;;  %1460 = vmatpush3.msra.mxu1 %v1833_v56 }
 0x339   :  { %1007 = vmatprep.subr.mxu0 %v1766_v42  ;;  %1461 = vmatprep.subr.mxu1 %v2235_v46 }
 0x33a   :  { %1008 = vmatpush1.msra.mxu0 %v1770_v43  ;;  %1462 = vmatpush3.msra.mxu1 %v2236_v2 }
 0x33b   :  { %1009 = vmatprep.subr.mxu0 %v2237_v22  ;;  %1463 = vmatprep.subr.mxu1 %v2235_v46 }
 0x33c   :  { %1010 = vmatpush1.msra.mxu0 %v2238_v28  ;;  %1464 = vmatpush3.msra.mxu1 %v2254_v7 }
 0x33d   :  { %1011 = vmatprep.subr.mxu0 %v2255_v8  ;;  %1465 = vmatprep.subr.mxu1 %v2235_v46 }
 0x33e   :  { %1012 = vmatpush1.msra.mxu0 %v2256_v9  ;;  %1045 = vmatprep.mubr.f32.mxu0 %v2235_v46 }
 0x33f   :  { %1466 = vmatpush3.msra.mxu1 %v2257_v10  ;;  %1467 = vmatprep.mubr.msk.f32.mxu1 %vm1574_vm0, %v2235_v46 }
 0x3df   :  { %v884_v12 = vpop.f32.mrf.mxu0  ;;  %v955_v13 = vpop.f32.mrf.mxu1 }
 0x3e0   :  { %v959_v15 = vadd.f32 %v884_v12, %v2258_v14  ;;  %v973_v31 = vadd.f32 %v1956_v48, %v955_v13 }
 0x3e1   :  { %v1434_v17 = vpop.f32.mrf.mxu1  ;;  %v886_v20 = vpop.f32.mrf.mxu0 }
 0x3e2   :  { %v1180_v18 = vmul.f32 -1.442695, %v959_v15  ;;  %v966_v23 = vadd.f32 %v886_v20, %v2259_v21 }
 0x3e4   :  { %1506 = vpow2.f32 %v1180_v18  ;;  %v1181_v24 = vmul.f32 -1.442695, %v966_v23 }
 0x3e6   :  { %1508 = vpow2.f32 %v1181_v24 }
 0x3f1   :  { %v1507_v26 = vpop.eup %1506 }
 0x3f2   :  { %v963_v27 = vadd.f32 1.0, %v1507_v26 }
 0x3f3   :  { %v1509_v29 = vpop.eup %1508 }
 0x3f4   :  { %1510 = vrcp.f32 %v963_v27  ;;  %v970_v30 = vadd.f32 1.0, %v1509_v29 }
 0x3f6   :  { %1512 = vrcp.f32 %v970_v30 }
 0x401   :  { %v1511_v32 = vpop.eup %1510 }
 0x402   :  { %v974_v33 = vmul.f32 %v1511_v32, %v973_v31 }
 0x403   :  { %v1513_v36 = vpop.eup %1512 }
 0x404   :  { %v975_v35 = vadd.f32 %v974_v33, %v2260_v34  ;;  %v977_v37 = vsub.f32 1.0, %v1513_v36  ;;  %v979_v40 = vmul.f32 %v1513_v36, %v2111_v11 }
 0x406   :  { %1514 = vtanh.f32 %v975_v35 }
 0x413   :  { %v1515_v38 = vpop.eup %1514 }
 0x414   :  { %v978_v39 = vmul.f32 %v1515_v38, %v977_v37 }
 0x416   :  { %v980_v41 = vadd.f32 %v979_v40, %v978_v39 }
 0x418   :  { %1046 = vmatmul.mubr.f32.vlgmr.msra.gmra.mxu0 %v980_v41  ;;  %1468 = vmatmul.mubr.f32.vlgmr.msra.gmra.mxu1 %v980_v41 }
 0x4d8   :  { %v1047_v42 = vpop.f32.mrf.mxu0  ;;  %v1118_v43 = vpop.f32.mrf.mxu1 }
 0x4d9   :  { %v1122_v47 = vadd.f32 %v1047_v42, %v2261_v44  ;;  %v1136_v28 = vadd.f32 %v1956_v48, %v1118_v43 }
 0x4da   :  { %v1469_v50 = vpop.f32.mrf.mxu1  ;;  %v1049_v52 = vpop.f32.mrf.mxu0 }
 0x4db   :  { %v1182_v51 = vmul.f32 -1.442695, %v1122_v47  ;;  %v1129_v54 = vadd.f32 %v1049_v52, %v2262_v53 }
 0x4dd   :  { %1516 = vpow2.f32 %v1182_v51  ;;  %v1183_v55 = vmul.f32 -1.442695, %v1129_v54 }
 0x4df   :  { %1518 = vpow2.f32 %v1183_v55 }
 0x4ea   :  { %v1517_v56 = vpop.eup %1516 }
 0x4eb   :  { %v1126_v46 = vadd.f32 1.0, %v1517_v56 }
 0x4ec   :  { %v1519_v2 = vpop.eup %1518 }
 0x4ed   :  { %1520 = vrcp.f32 %v1126_v46  ;;  %v1133_v22 = vadd.f32 1.0, %v1519_v2 }
 0x4ef   :  { %1522 = vrcp.f32 %v1133_v22 }
 0x4fa   :  { %v1521_v4 = vpop.eup %1520 }
 0x4fb   :  { %v1137_v57 = vmul.f32 %v1521_v4, %v1136_v28 }
 0x4fc   :  { %v1523_v0 = vpop.eup %1522 }
 0x4fd   :  { %v1138_v61 = vadd.f32 %v1137_v57, %v2263_v6  ;;  %v1140_v45 = vsub.f32 1.0, %v1523_v0  ;;  %v1142_v62 = vmul.f32 %v1523_v0, %v980_v41 }
 0x4ff   :  { %1524 = vtanh.f32 %v1138_v61 }
 0x50c   :  { %v1525_v60 = vpop.eup %1524 }
 0x50d   :  { %v1141_v49 = vmul.f32 %v1525_v60, %v1140_v45 }
 0x50f   :  { %v1143_v5 = vadd.f32 %v1142_v62, %v1141_v49 }
 0x511   :  { %1144 = vst [vmem:[#allocation5] sm:$0xff] %v1143_v5 }
 0x512   :  { %1557 = shalt.err (!%p1554_p9)
}
 0x513   :  { %1154 = dma.vmem_to_hbm [thread:$0]  %s1152_s22, 128, %s2197_s5, [#allocation4]  }
 0x514   :  { %1568 = dma.done.wait [#allocation4], 128  }
 0x515   :  { %1569 = vsyncadd [#allocation4], 4294967168 }
 0x516   :  { %1158 = vsyncpa [#allocation3], 1 }
 0x517   :  { %1159 = vsyncpa [#allocation4], 1 }

</bundles_post_ra>
